<compile_context>
chip_gen: v7x
topology: tpu7x:2x2x1
jax: 0.10.0
libtpu: 0.0.40
codegen_flags: <defaults>
</compile_context>

<pallas_src>
from functools import lru_cache

import numpy as np
import jax
import jax.numpy as jnp
from jax.experimental import pallas as pl
from jax.experimental.pallas import tpu as pltpu

C_IN = 8
C_OUT = 50
KERNEL_SIZES = (3, 4, 5)
KMAX = KERNEL_SIZES[-1]          # 5
N_OUT = 3 * C_OUT                # 150
N_PAD = 256                      # lane-dense fused output width (150 -> 256)
K_COLS = KMAX * C_IN             # 40
NEG = -1e30
ROWS_MAX = 4096                  # caps tb*lt -> f32 intermediate <= 4 MiB / step


def _cnn_kernel(x_ref, w_ref, b_ref, mask_ref, out_ref):
    # x_ref:   (tb, lt, 40)  bf16  im2col input chunk (one time chunk)
    # w_ref:   (40, 256)     bf16  fused conv weights (lanes 150..255 zero)
    # b_ref:   (1, 256)      f32   fused biases       (lanes 150..255 zero)
    # mask_ref:(lt, 256)     f32   0 for valid time positions, -1e30 otherwise
    # out_ref: (tb, 256)     f32   resident across the time grid axis
    t = pl.program_id(1)
    tb, lt, kc = x_ref.shape

    # lt % 16 == 0 -> this collapse never crosses a packed bf16 sublane tile.
    x = x_ref[...].reshape(tb * lt, kc)
    y = jnp.dot(x, w_ref[...], preferred_element_type=jnp.float32)   # (tb*lt, 256)
    # f32 validity mask applied BEFORE the max (see correctness coupling above).
    y = y.reshape(tb, lt, N_PAD) + mask_ref[...][None, :, :]
    cmax = jnp.max(y, axis=1)                                        # (tb, 256)

    @pl.when(t == 0)
    def _():
        out_ref[...] = jnp.full_like(out_ref, NEG)

    out_ref[...] = jnp.maximum(out_ref[...], cmax)                   # running max

    @pl.when(t == pl.num_programs(1) - 1)
    def _():
        # bias + ReLU hoisted past the max (bias constant over time, ReLU monotone).
        out_ref[...] = jnp.maximum(out_ref[...] + b_ref[...], 0.0)


def _round_up(v, m):
    return ((v + m - 1) // m) * m


def _pick_tiles(b, lout):
    """VMEM-aware tile picking. Guarantees an even (>=2) batch grid, lt % 16 == 0."""
    lt = min(128, _round_up(lout, 16))               # time chunk (bf16 sublane pack = 16)
    tb = min(256, max(8, (ROWS_MAX // lt) // 8 * 8))  # keep tb*lt <= ROWS_MAX, tb % 8 == 0
    tb = min(tb, _round_up(b, 8))                     # don't vastly over-pad tiny batches
    nt = -(-lout // lt)                               # cdiv
    nb = max(2, -(-b // tb))                          # >= 2 grid steps (pipelining)
    if nb % 2:                                        # even count -> v7x megacore balance
        nb += 1
    return tb, lt, nb, nt


def fuse_params(params):
    """Hoisted out of the forward path: fuse 3 conv weights/biases, pad N to 256."""
    w = jnp.zeros((KMAX, C_IN, N_PAD), jnp.float32)
    w = w.at[:3, :, 0:C_OUT].set(params["w3"])
    w = w.at[:4, :, C_OUT:2 * C_OUT].set(params["w4"])
    w = w.at[:5, :, 2 * C_OUT:3 * C_OUT].set(params["w5"])
    w = w.reshape(K_COLS, N_PAD).astype(jnp.bfloat16)
    b = jnp.zeros((1, N_PAD), jnp.float32)
    b = b.at[:, 0:C_OUT].set(params["b3"])
    b = b.at[:, C_OUT:2 * C_OUT].set(params["b4"])
    b = b.at[:, 2 * C_OUT:3 * C_OUT].set(params["b5"])
    return w, b


@lru_cache(maxsize=None)
def _time_mask(l, lp):
    """mask[t, c] = 0 where conv output t is valid for fused channel c, else -1e30.
    Cached per (L, Lp); padded lanes (150..255) are fully masked."""
    valid = np.zeros((N_PAD,), np.int64)
    valid[0:C_OUT] = l - 3 + 1
    valid[C_OUT:2 * C_OUT] = l - 4 + 1
    valid[2 * C_OUT:3 * C_OUT] = l - 5 + 1
    t = np.arange(lp)[:, None]
    m = np.where(t < valid[None, :], 0.0, NEG).astype(np.float32)
    return jnp.asarray(m)


def cnn_forward(x, w_fused, b_fused):
    """x: (B, L, 8) float32.  w_fused/b_fused: from fuse_params(params)."""
    B, L, c = x.shape
    assert c == C_IN and L >= KMAX, "need L >= 5 and 8 input channels"
    lout = L - KERNEL_SIZES[0] + 1                    # valid positions for k=3 (the longest)

    tb, lt, nb, nt = _pick_tiles(B, lout)
    lp = nt * lt
    bp = nb * tb

    # One fused wrapper pass: pad batch+time with zeros, build the lane-dense
    # (Bp, Lp, 40) bf16 im2col slab (taps j = 0..4 along lanes).  Padded batch
    # rows / time rows are neutralized by slicing / the f32 mask respectively.
    xp = jnp.pad(x, ((0, bp - B), (0, lp + KMAX - 1 - L), (0, 0)))
    x_cols = jnp.concatenate([xp[:, j:j + lp, :] for j in range(KMAX)], axis=-1)
    x_cols = x_cols.astype(jnp.bfloat16)

    mask = _time_mask(L, lp)

    out = pl.pallas_call(
        _cnn_kernel,
        out_shape=jax.ShapeDtypeStruct((bp, N_PAD), jnp.float32),
        grid_spec=pltpu.PrefetchScalarGridSpec(
            num_scalar_prefetch=0,
            grid=(nb, nt),                                        # (batch tiles, time chunks)
            in_specs=[
                pl.BlockSpec((tb, lt, K_COLS), lambda i, t: (i, t, 0)),  # x chunk
                pl.BlockSpec((K_COLS, N_PAD), lambda i, t: (0, 0)),      # fused weights (resident)
                pl.BlockSpec((1, N_PAD), lambda i, t: (0, 0)),           # fused bias
                pl.BlockSpec((lt, N_PAD), lambda i, t: (t, 0)),          # time-validity mask chunk
            ],
            out_specs=pl.BlockSpec((tb, N_PAD), lambda i, t: (i, 0)),    # resident across t
        ),
        compiler_params=pltpu.CompilerParams(
            dimension_semantics=("parallel", "arbitrary"),
            vmem_limit_bytes=48 * 1024 * 1024,   # headroom on v5e/v6e; <= review's v7x ceiling
        ),
    )(x_cols, w_fused, b_fused, mask)

    return out[:B, :N_OUT]                            # drop padded batch rows & lanes


def init_params(key):
    """Deterministic init. Weights stored as (k, C_IN, C_OUT), biases as (1, C_OUT)."""
    params = {}
    for name, k in zip(("3", "4", "5"), KERNEL_SIZES):
        key, kw, kb = jax.random.split(key, 3)
        bound = 1.0 / jnp.sqrt(C_IN * k)              # PyTorch Conv1d default range
        params["w" + name] = jax.random.uniform(kw, (k, C_IN, C_OUT), jnp.float32, -bound, bound)
        params["b" + name] = jax.random.uniform(kb, (1, C_OUT), jnp.float32, -bound, bound)
    return params


def reference_forward(x, params):
    """Pure-JAX f32 reference mirroring the PyTorch module."""
    outs = []
    L = x.shape[1]
    for name, k in zip(("3", "4", "5"), KERNEL_SIZES):
        w, b = params["w" + name], params["b" + name]
        lout = L - k + 1
        acc = jnp.zeros((x.shape[0], lout, C_OUT), jnp.float32) + b[0]
        for j in range(k):
            acc = acc + jnp.einsum("blc,co->blo", x[:, j:j + lout, :], w[j])
        acc = jnp.maximum(acc, 0.0)
        outs.append(jnp.max(acc, axis=1))
    return jnp.concatenate(outs, axis=1)


if __name__ == "__main__":
    key = jax.random.PRNGKey(0)
    key, kx1, kx2 = jax.random.split(key, 3)

    params = init_params(key)
    w_fused, b_fused = fuse_params(params)            # hoisted: computed once, not per forward
    fwd = jax.jit(cnn_forward)

    # Small demo shape from the module: (B, L, 8).
    B, L = 2, 16
    x = jax.random.normal(kx1, (B, L, C_IN), jnp.float32)
    out = jax.block_until_ready(fwd(x, w_fused, b_fused))
    ref = reference_forward(x, params)
    assert out.shape == (B, N_OUT), out.shape
    # Tolerance accounts for bf16 matmul inputs (f32 accumulation) in the kernel.
    assert jnp.allclose(out, ref, atol=2e-2, rtol=2e-2), "mismatch vs reference (small)"

    # Second shape exercises batch padding (B=5 -> 2 tiles) and >1 time chunk.
    B2, L2 = 5, 200
    x2 = jax.random.normal(kx2, (B2, L2, C_IN), jnp.float32)
    out2 = jax.block_until_ready(fwd(x2, w_fused, b_fused))
    ref2 = reference_forward(x2, params)
    assert out2.shape == (B2, N_OUT), out2.shape
    assert jnp.allclose(out2, ref2, atol=2e-2, rtol=2e-2), "mismatch vs reference (tiled)"

    print("KERNEL_OK")
</pallas_src>

<mosaic_0001>
module attributes {stable_mosaic.version = 11 : i64} {
  func.func @_cnn_kernel(%arg0: i32, %arg1: i32, %arg2: memref<8x16x40xbf16, #tpu.memory_space<vmem>>, %arg3: memref<40x256xbf16, #tpu.memory_space<vmem>>, %arg4: memref<1x256xf32, #tpu.memory_space<vmem>>, %arg5: memref<16x256xf32, #tpu.memory_space<vmem>>, %arg6: memref<8x256xf32, #tpu.memory_space<vmem>>) attributes {dimension_semantics = [#tpu.dimension_semantics<parallel>, #tpu.dimension_semantics<arbitrary>], iteration_bounds = array<i64: 2, 1>, scalar_prefetch = 0 : i64, scratch_operands = 0 : i64, tpu.core_type = #tpu.core_type<tc>, window_params = [{transform_indices = @transform_0, window_bounds = array<i64: 8, 16, 40>}, {pipeline_mode = #tpu.pipeline_mode<synchronous>, transform_indices = @transform_1, window_bounds = array<i64: 40, 256>}, {pipeline_mode = #tpu.pipeline_mode<synchronous>, transform_indices = @transform_2, window_bounds = array<i64: 1, 256>}, {transform_indices = @transform_3, window_bounds = array<i64: 16, 256>}, {transform_indices = @transform_4, window_bounds = array<i64: 8, 256>}]} {
    %c0 = arith.constant 0 : index
    %c0_0 = arith.constant 0 : index
    %c0_1 = arith.constant 0 : index
    %0 = vector.load %arg2[%c0, %c0_0, %c0_1] : memref<8x16x40xbf16, #tpu.memory_space<vmem>>, vector<8x16x40xbf16>
    %1 = vector.shape_cast %0 : vector<8x16x40xbf16> to vector<128x40xbf16>
    %c0_2 = arith.constant 0 : index
    %c0_3 = arith.constant 0 : index
    %2 = vector.load %arg3[%c0_2, %c0_3] : memref<40x256xbf16, #tpu.memory_space<vmem>>, vector<40x256xbf16>
    %cst = arith.constant dense<0.000000e+00> : vector<128x256xf32>
    %3 = tpu.matmul %1, %2, %cst {dimension_numbers = #tpu.dot_dimension_numbers<[1], [0], [0], [1], [0, 0, 1, 1], [], []>} : vector<128x40xbf16>, vector<40x256xbf16>, vector<128x256xf32> -> vector<128x256xf32>
    %4 = vector.shape_cast %3 : vector<128x256xf32> to vector<8x16x256xf32>
    %c0_4 = arith.constant 0 : index
    %c0_5 = arith.constant 0 : index
    %5 = vector.load %arg5[%c0_4, %c0_5] : memref<16x256xf32, #tpu.memory_space<vmem>>, vector<16x256xf32>
    %6 = vector.shape_cast %5 : vector<16x256xf32> to vector<1x16x256xf32>
    %7 = vector.broadcast %6 : vector<1x16x256xf32> to vector<8x16x256xf32>
    %8 = arith.addf %4, %7 : vector<8x16x256xf32>
    %cst_6 = arith.constant dense<0xFF800000> : vector<8x256xf32>
    %9 = vector.multi_reduction <maximumf>, %8, %cst_6 [1] : vector<8x16x256xf32> to vector<8x256xf32>
    %c0_i32 = arith.constant 0 : i32
    %10 = arith.cmpi eq, %arg1, %c0_i32 : i32
    %11 = arith.extui %10 : i1 to i32
    %c0_i32_7 = arith.constant 0 : i32
    %12 = arith.cmpi ne, %11, %c0_i32_7 : i32
    scf.if %12 {
      %cst_14 = arith.constant -1.000000e+30 : f32
      %19 = vector.broadcast %cst_14 : f32 to vector<8x256xf32>
      %c0_15 = arith.constant 0 : index
      %c0_16 = arith.constant 0 : index
      %20 = vector.load %arg6[%c0_15, %c0_16] : memref<8x256xf32, #tpu.memory_space<vmem>>, vector<8x256xf32>
      tpu.vector_store %arg6[%c0_15, %c0_16], %19 {strides = array<i32>} : memref<8x256xf32, #tpu.memory_space<vmem>>, vector<8x256xf32>,
    } else {
    }
    %c0_8 = arith.constant 0 : index
    %c0_9 = arith.constant 0 : index
    %13 = vector.load %arg6[%c0_8, %c0_9] : memref<8x256xf32, #tpu.memory_space<vmem>>, vector<8x256xf32>
    %14 = arith.maximumf %13, %9 : vector<8x256xf32>
    %c0_10 = arith.constant 0 : index
    %c0_11 = arith.constant 0 : index
    %15 = vector.load %arg6[%c0_10, %c0_11] : memref<8x256xf32, #tpu.memory_space<vmem>>, vector<8x256xf32>
    tpu.vector_store %arg6[%c0_10, %c0_11], %14 {strides = array<i32>} : memref<8x256xf32, #tpu.memory_space<vmem>>, vector<8x256xf32>,
    %c0_i32_12 = arith.constant 0 : i32
    %16 = arith.cmpi eq, %arg1, %c0_i32_12 : i32
    %17 = arith.extui %16 : i1 to i32
    %c0_i32_13 = arith.constant 0 : i32
    %18 = arith.cmpi ne, %17, %c0_i32_13 : i32
    scf.if %18 {
      %c0_14 = arith.constant 0 : index
      %c0_15 = arith.constant 0 : index
      %19 = vector.load %arg6[%c0_14, %c0_15] : memref<8x256xf32, #tpu.memory_space<vmem>>, vector<8x256xf32>
      %c0_16 = arith.constant 0 : index
      %c0_17 = arith.constant 0 : index
      %20 = vector.load %arg4[%c0_16, %c0_17] : memref<1x256xf32, #tpu.memory_space<vmem>>, vector<1x256xf32>
      %21 = vector.broadcast %20 : vector<1x256xf32> to vector<8x256xf32>
      %22 = arith.addf %19, %21 : vector<8x256xf32>
      %cst_18 = arith.constant 0.000000e+00 : f32
      %23 = vector.broadcast %cst_18 : f32 to vector<8x256xf32>
      %24 = arith.maximumf %22, %23 : vector<8x256xf32>
      %c0_19 = arith.constant 0 : index
      %c0_20 = arith.constant 0 : index
      %25 = vector.load %arg6[%c0_19, %c0_20] : memref<8x256xf32, #tpu.memory_space<vmem>>, vector<8x256xf32>
      tpu.vector_store %arg6[%c0_19, %c0_20], %24 {strides = array<i32>} : memref<8x256xf32, #tpu.memory_space<vmem>>, vector<8x256xf32>,
    } else {
    }
    return
  }
  func.func @transform_0(%arg0: i32, %arg1: i32) -> (i32, i32, i32) {
    %c0_i32 = arith.constant 0 : i32
    %c0_i32_0 = arith.constant 0 : i32
    return %arg0, %arg1, %c0_i32 : i32, i32, i32
  }
  func.func @transform_1(%arg0: i32, %arg1: i32) -> (i32, i32) {
    %c0_i32 = arith.constant 0 : i32
    %c0_i32_0 = arith.constant 0 : i32
    %c0_i32_1 = arith.constant 0 : i32
    return %c0_i32, %c0_i32_0 : i32, i32
  }
  func.func @transform_2(%arg0: i32, %arg1: i32) -> (i32, i32) {
    %c0_i32 = arith.constant 0 : i32
    %c0_i32_0 = arith.constant 0 : i32
    %c0_i32_1 = arith.constant 0 : i32
    return %c0_i32, %c0_i32_0 : i32, i32
  }
  func.func @transform_3(%arg0: i32, %arg1: i32) -> (i32, i32) {
    %c0_i32 = arith.constant 0 : i32
    %c0_i32_0 = arith.constant 0 : i32
    return %arg1, %c0_i32 : i32, i32
  }
  func.func @transform_4(%arg0: i32, %arg1: i32) -> (i32, i32) {
    %c0_i32 = arith.constant 0 : i32
    %c0_i32_0 = arith.constant 0 : i32
    return %arg0, %c0_i32 : i32, i32
  }
}

</mosaic_0001>

<bundles_post_ra>
// kernel: cnn_forward.1
= control target key start
LH: loop header
LB: loop body
LE: loop exit
PB: predicated region body
PF: predicated region fallthrough
CT: control target
= control target key end

     0   :  { %s931_s15 = smov 0   ;;  %s933_s16 = smov 0   ;;  %s1080_s0 = inlined_call_operand.vmem [shape: bf16[16,16,40], index: 0, kind: input, shape index: {}]   ;;  %s1081_s1 = inlined_call_operand.vmem [shape: bf16[40,256], index: 1, kind: input, shape index: {}]   ;;  %s1082_s2 = inlined_call_operand.vmem [shape: f32[1,256], index: 2, kind: input, shape index: {}]   ;;  %s1083_s3 = inlined_call_operand.vmem [shape: f32[16,256], index: 3, kind: input, shape index: {}]   ;;  %s1084_s4 = inlined_call_operand.vmem [shape: f32[16,256], index: 4, kind: output, shape index: {}]  }
   0x1   :  { %s935_s17 = smov 0  }
   0x2 LB: > { %s26_s18 = sadd.s32 1, %s899_s16  ;;  %p800_p0 = scmp.ge.s32.totalorder %s903_s17, 1  ;;  %s903_s17 = sphi %s935_s17, %s14_s17   ;;  %s899_s16 = sphi %s933_s16, %s1086_s16   ;;  %s895_s15 = sphi %s931_s15, %s1085_s15  }
   0x3   : > { %p28_p1 = scmp.ge.s32.totalorder %s26_s18, 2  ;;  %p195_p2 = scmp.lt.s32.totalorder %s903_s17, 3 }
   0x5   : > { %s1088_s18 = smov (%p28_p1, %s26_s18), 0  ;;  %p196_p3 = pnand %p800_p0, %p195_p2 }
   0x6   : > { %v865_v0 = vld [vmem:[%s1081_s1 + $0x4] ss:$8 sps:$4 sm:$0xff] (!%p196_p3)   ;;  %v867_v1 = vld [vmem:[%s1081_s1] ss:$8 sps:$4 sm:$0xff] (!%p196_p3)   ;;  %v905_v2 = vmov (!%p196_p3), 0   ;;  %s801_s23 = sshll.u32 (!%p196_p3), %s895_s15, 3 }
   0x7   : > { %199 = sbr.rel (%p196_p3) target bundleno = 287 (0x11f), region = 36  ;;  %407 = vmatprep.mubr.bf16.mxu0 (!%p196_p3), %v905_v2  ;;  %447 = vmatprep.mubr.bf16.mxu1 (!%p196_p3), %v905_v2  ;;  %v868_v3 = vld [vmem:[%s1081_s1 + $0x14] ss:$8 sps:$4 sm:$0xff] (!%p196_p3)   ;;  %v277_v4 = vld [vmem:[%s1081_s1 + $0x20] sm:$0xff] (!%p196_p3)  ;;  %p234_p4 = scmp.lt.s32.totalorder (!%p196_p3), %s801_s23, 15  ;;  %vm368_vm0 = vcmask (!%p196_p3), 1043456  }
   0x8   : > { %375 = vmatprep.subr.bf16.mxu0 (!%p196_p3), %v865_v0  ;;  %833 = vmatprep.subr.bf16.mxu1 (!%p196_p3), %v865_v0  ;;  %v870_v5 = vld [vmem:[%s1081_s1 + $0x10] ss:$8 sps:$4 sm:$0xff] (!%p196_p3)   ;;  %v819_v6 = vcombine.high (!%p196_p3), %v277_v4, %v277_v4  ;;  %v818_v7 = vcombine.low (!%p196_p3), %v277_v4, %v277_v4  ;;  %vm343_vm1 = vcmask (!%p196_p3), 326656   ;;  %v981_v18 = vld [vmem:[%s1083_s3] sm:$0xff] (!%p196_p3)  ;;  %v992_v23 = vld [vmem:[%s1083_s3 + $0x8] sm:$0xff] (!%p196_p3)  ;;  %vm660_vm2 = vcmask (!%p196_p3), 1041409  }
   0x9   : > { %376 = vmatpush1.bf16.msra.mxu0 (!%p196_p3), %v867_v1  ;;  %836 = vmatpush1.bf16.msra.mxu1 (!%p196_p3), %v867_v1  ;;  %v986_v20 = vld [vmem:[%s1083_s3 + $0x10] sm:$0xff] (!%p196_p3)  ;;  %v997_v25 = vld [vmem:[%s1083_s3 + $0x18] sm:$0xff] (!%p196_p3)  ;;  %vm662_vm3 = vcmask (!%p196_p3), 1042434   ;;  %vm664_vm4 = vcmask (!%p196_p3), 1043459   ;;  %vm666_vm5 = vcmask (!%p196_p3), 1044484   ;;  %vm668_vm6 = vcmask (!%p196_p3), 1045509  }
   0xa   : > { %377 = vmatprep.subr.bf16.mxu0 (!%p196_p3), %v868_v3  ;;  %834 = vmatprep.subr.bf16.mxu1 (!%p196_p3), %v868_v3  ;;  %v370_v8 = vsel (!%p196_p3), %vm368_vm0, %v818_v7, 0  ;;  %p251_p5 = scmp.lt.s32.totalorder (!%p196_p3), %s895_s15, 1  ;;  %vm670_vm7 = vcmask (!%p196_p3), 1046534   ;;  %vm672_vm8 = vcmask (!%p196_p3), 1047559  }
   0xd   : > { %378 = vmatpush1.bf16.msra.mxu0 (!%p196_p3), %v870_v5  ;;  %837 = vmatpush1.bf16.msra.mxu1 (!%p196_p3), %v870_v5 }
   0xe   : > { %s1090_s23 = smov (!%p234_p4, %s801_s23), 15  ;;  %820 = vmatprep.subr.msk.bf16.mxu0 %vm368_vm0, %v819_v6  ;;  %835 = vmatprep.subr.msk.bf16.mxu1 %vm368_vm0, %v819_v6  ;;  %s1092_s15 = smov (!%p251_p5, %s895_s15), 1 }
   0xf   : > { %s831_s30 = sshll.u32 %s1090_s23, 3  ;;  %s832_s22 = sshll.u32 %s1092_s15, 4 }
  0x10   : > { %s241_s7 = scalar_lea.vmem %s1080_s0, %s831_s30  ;;  %s255_s25 = scalar_lea.vmem %s1084_s4, %s832_s22 }
  0x11   : > { %v873_v9 = vld [vmem:[%s241_s7] sm:$0xff]   ;;  %380 = vmatpush1.bf16.msra.mxu0 %v370_v8  ;;  %838 = vmatpush1.bf16.msra.mxu1 %v370_v8  ;;  %v875_v11 = vld [vmem:[%s241_s7 + $0x8] sm:$0xff]   ;;  %v877_v13 = vld [vmem:[%s241_s7 + $0x10] sm:$0xff]  }
  0x12   : > { %v874_v10 = vld [vmem:[%s241_s7 + $0x20] sm:$0xff]   ;;  %v876_v12 = vld [vmem:[%s241_s7 + $0x28] sm:$0xff]   ;;  %v878_v14 = vld [vmem:[%s241_s7 + $0x30] sm:$0xff]  }
  0x13   : > { %v879_v15 = vld [vmem:[%s241_s7 + $0x18] sm:$0xff]  }
  0x14   : > { %821 = vmatmul.mubr.msk.bf16.vlgmr.msra.gmra.mrb[0].mxu0 %vm343_vm1, %v873_v9  ;;  %825 = vmatmul.mubr.msk.bf16.vlgmr.msra.gmra.mrb[0].mxu1 %vm343_vm1, %v874_v10  ;;  %v880_v16 = vld [vmem:[%s241_s7 + $0x38] sm:$0xff]  }
  0x15   : > { %417 = vmatprep.mubr.bf16.mxu0 %v905_v2  ;;  %457 = vmatprep.mubr.bf16.mxu1 %v905_v2 }
  0x1c   : > { %822 = vmatmul.mubr.msk.bf16.gmra.mrb[4].mxu0 %vm343_vm1, %v875_v11  ;;  %826 = vmatmul.mubr.msk.bf16.gmra.mrb[4].mxu1 %vm343_vm1, %v876_v12 }
  0x1d   : > { %427 = vmatprep.mubr.bf16.mxu0 %v905_v2  ;;  %467 = vmatprep.mubr.bf16.mxu1 %v905_v2 }
  0x24   : > { %823 = vmatmul.mubr.msk.bf16.gmra.mrb[8].mxu0 %vm343_vm1, %v877_v13  ;;  %827 = vmatmul.mubr.msk.bf16.gmra.mrb[8].mxu1 %vm343_vm1, %v878_v14 }
  0x25   : > { %437 = vmatprep.mubr.bf16.mxu0 %v905_v2  ;;  %477 = vmatprep.mubr.bf16.mxu1 %v905_v2 }
  0x2c   : > { %824 = vmatmul.mubr.msk.bf16.gmra.mrb[12].mxu0 %vm343_vm1, %v879_v15  ;;  %828 = vmatmul.mubr.msk.bf16.gmra.mrb[12].mxu1 %vm343_vm1, %v880_v16 }
  0xe7   : > { %v409_v17 = vpop.f32.mrb[0].mxu0  ;;  %v449_v19 = vpop.f32.mrb[0].mxu1 }
  0xe8   : > { %v508_v21 = vadd.f32 %v981_v18, %v449_v19  ;;  %v411_v22 = vpop.f32.mrb[1].mxu0  ;;  %v451_v24 = vpop.f32.mrb[1].mxu1  ;;  %v492_v29 = vadd.f32 %v981_v18, %v409_v17  ;;  %v694_v19 = vlaneseq }
  0xe9   : > { %v509_v26 = vadd.f32 %v992_v23, %v451_v24  ;;  %v413_v27 = vpop.f32.mrb[2].mxu0  ;;  %v453_v28 = vpop.f32.mrb[2].mxu1  ;;  %v493_v34 = vadd.f32 %v992_v23, %v411_v22 }
  0xea   : > { %v494_v30 = vadd.f32 %v986_v20, %v413_v27  ;;  %v510_v31 = vadd.f32 %v986_v20, %v453_v28  ;;  %v415_v32 = vpop.f32.mrb[3].mxu0  ;;  %v455_v33 = vpop.f32.mrb[3].mxu1 }
  0xeb   : > { %v495_v35 = vadd.f32 %v997_v25, %v415_v32  ;;  %v511_v36 = vadd.f32 %v997_v25, %v455_v33 }
  0xec   : > { %v524_v37 = vmax.f32 %v492_v29, %v494_v30  ;;  %v580_v38 = vmax.f32 %v508_v21, %v510_v31 }
  0xed   : > { %v531_v39 = vmax.f32 %v493_v34, %v495_v35  ;;  %v587_v40 = vmax.f32 %v509_v26, %v511_v36 }
  0xee   : > { %v525_v41 = vrot.slane %v524_v37, 4  ;;  %v581_v49 = vrot.slane %v580_v38, 4 }
  0xef   : > { %v532_v42 = vrot.slane %v531_v39, 4  ;;  %v419_v43 = vpop.f32.mrb[4].mxu0  ;;  %v459_v44 = vpop.f32.mrb[4].mxu1  ;;  %v588_v5 = vrot.slane %v587_v40, 4 }
  0xf0   : > { %v526_v45 = vmax.f32 %v524_v37, %v525_v41  ;;  %v512_v46 = vadd.f32 %v981_v18, %v459_v44  ;;  %v421_v47 = vpop.f32.mrb[5].mxu0  ;;  %v461_v48 = vpop.f32.mrb[5].mxu1  ;;  %v496_v54 = vadd.f32 %v981_v18, %v419_v43  ;;  %v582_v4 = vmax.f32 %v580_v38, %v581_v49 }
  0xf1   : > { %v533_v50 = vmax.f32 %v531_v39, %v532_v42  ;;  %v513_v51 = vadd.f32 %v992_v23, %v461_v48  ;;  %v423_v52 = vpop.f32.mrb[6].mxu0  ;;  %v463_v53 = vpop.f32.mrb[6].mxu1  ;;  %v497_v55 = vadd.f32 %v992_v23, %v421_v47  ;;  %v1018_v22 = vmax.f32 %v587_v40, %v588_v5 }
  0xf2   : > { %v498_v56 = vadd.f32 %v986_v20, %v423_v52  ;;  %v514_v57 = vadd.f32 %v986_v20, %v463_v53  ;;  %v425_v58 = vpop.f32.mrb[7].mxu0  ;;  %v465_v59 = vpop.f32.mrb[7].mxu1  ;;  %v527_v60 = vrot.slane %v526_v45, 2  ;;  %v583_v21 = vrot.slane %v582_v4, 2 }
  0xf3   : > { %v534_v61 = vrot.slane %v533_v50, 2  ;;  %v499_v62 = vadd.f32 %v997_v25, %v425_v58  ;;  %v515_v63 = vadd.f32 %v997_v25, %v465_v59  ;;  %v590_v58 = vrot.slane %v1018_v22, 2 }
  0xf4   : > { %v538_v0 = vmax.f32 %v496_v54, %v498_v56  ;;  %v1014_v1 = vmax.f32 %v512_v46, %v514_v57  ;;  %v528_v7 = vmax.f32 %v526_v45, %v527_v60 }
  0xf5   : > { %v545_v2 = vmax.f32 %v497_v55, %v499_v62  ;;  %v1016_v3 = vmax.f32 %v513_v51, %v515_v63  ;;  %v535_v8 = vmax.f32 %v533_v50, %v534_v61  ;;  %v1031_v63 = vmax.f32 %v582_v4, %v583_v21 }
  0xf6   : > { %v539_v6 = vrot.slane %v538_v0, 4  ;;  %v529_v29 = vrot.slane %v528_v7, 1  ;;  %v595_v42 = vrot.slane %v1014_v1, 4 }
  0xf7   : > { %v546_v9 = vrot.slane %v545_v2, 4  ;;  %v429_v10 = vpop.f32.mrb[8].mxu0  ;;  %v469_v11 = vpop.f32.mrb[8].mxu1  ;;  %v536_v30 = vrot.slane %v535_v8, 1  ;;  %v602_v46 = vrot.slane %v1016_v3, 4 }
  0xf8   : > { %v540_v12 = vmax.f32 %v538_v0, %v539_v6  ;;  %v431_v13 = vpop.f32.mrb[9].mxu0  ;;  %v471_v14 = vpop.f32.mrb[9].mxu1  ;;  %v516_v26 = vadd.f32 %v981_v18, %v469_v11  ;;  %v500_v34 = vadd.f32 %v981_v18, %v429_v10  ;;  %v530_v51 = vmax.f32 %v528_v7, %v529_v29 }
  0xf9   : > { %v547_v15 = vmax.f32 %v545_v2, %v546_v9  ;;  %v433_v16 = vpop.f32.mrb[10].mxu0  ;;  %v473_v17 = vpop.f32.mrb[10].mxu1  ;;  %v517_v32 = vadd.f32 %v992_v23, %v471_v14  ;;  %v501_v38 = vadd.f32 %v992_v23, %v431_v13  ;;  %v537_v57 = vmax.f32 %v535_v8, %v536_v30 }
  0xfa   : > { %v541_v24 = vrot.slane %v540_v12, 2  ;;  %v435_v27 = vpop.f32.mrb[11].mxu0  ;;  %v475_v28 = vpop.f32.mrb[11].mxu1  ;;  %v502_v35 = vadd.f32 %v986_v20, %v433_v16  ;;  %v518_v36 = vadd.f32 %v986_v20, %v473_v17  ;;  %v596_v2 = vmax.f32 %v1014_v1, %v595_v42 }
  0xfb   : > { %v548_v31 = vrot.slane %v547_v15, 2  ;;  %v503_v39 = vadd.f32 %v997_v25, %v435_v27  ;;  %v519_v40 = vadd.f32 %v997_v25, %v475_v28 }
  0xfc   : > { %v542_v33 = vmax.f32 %v540_v12, %v541_v24  ;;  %v552_v43 = vmax.f32 %v500_v34, %v502_v35  ;;  %v608_v44 = vmax.f32 %v516_v26, %v518_v36  ;;  %v603_v12 = vmax.f32 %v1016_v3, %v602_v46 }
  0xfd   : > { %v549_v37 = vmax.f32 %v547_v15, %v548_v31  ;;  %v559_v47 = vmax.f32 %v501_v38, %v503_v39  ;;  %v615_v48 = vmax.f32 %v517_v32, %v519_v40  ;;  %v597_v31 = vrot.slane %v596_v2, 2 }
  0xfe   : > { %v543_v41 = vrot.slane %v542_v33, 1  ;;  %v553_v53 = vrot.slane %v552_v43, 4  ;;  %v609_v54 = vrot.slane %v608_v44, 4 }
  0xff   : > { %v550_v45 = vrot.slane %v549_v37, 1  ;;  %v439_v49 = vpop.f32.mrb[12].mxu0  ;;  %v479_v50 = vpop.f32.mrb[12].mxu1  ;;  %v560_v60 = vrot.slane %v559_v47, 4  ;;  %v616_v8 = vrot.slane %v615_v48, 4 }
 0x100   : > { %v544_v52 = vmax.f32 %v542_v33, %v543_v41  ;;  %v441_v55 = vpop.f32.mrb[13].mxu0  ;;  %v481_v56 = vpop.f32.mrb[13].mxu1  ;;  %v554_v5 = vmax.f32 %v552_v43, %v553_v53  ;;  %v520_v11 = vadd.f32 %v981_v18, %v479_v50  ;;  %v610_v14 = vmax.f32 %v608_v44, %v609_v54 }
 0x101   : > { %v551_v59 = vmax.f32 %v549_v37, %v550_v45  ;;  %v443_v61 = vpop.f32.mrb[14].mxu0  ;;  %v483_v62 = vpop.f32.mrb[14].mxu1  ;;  %v561_v10 = vmax.f32 %v559_v47, %v560_v60  ;;  %v521_v4 = vadd.f32 %v992_v23, %v481_v56  ;;  %v504_v16 = vadd.f32 %v981_v18, %v439_v49 }
 0x102   : > { %v661_v0 = vsel %vm660_vm2, %v544_v52, %v530_v51  ;;  %v445_v6 = vpop.f32.mrb[15].mxu0  ;;  %v485_v7 = vpop.f32.mrb[15].mxu1  ;;  %v555_v13 = vrot.slane %v554_v5, 2  ;;  %v506_v1 = vadd.f32 %v986_v20, %v443_v61  ;;  %v522_v17 = vadd.f32 %v986_v20, %v483_v62 }
 0x103   : > { %v674_v9 = vsel %vm660_vm2, %v551_v59, %v537_v57  ;;  %v562_v15 = vrot.slane %v561_v10, 2  ;;  %v505_v24 = vadd.f32 %v992_v23, %v441_v55  ;;  %v507_v26 = vadd.f32 %v997_v25, %v445_v6 }
 0x104   : > { %v556_v21 = vmax.f32 %v554_v5, %v555_v13  ;;  %v523_v27 = vadd.f32 %v997_v25, %v485_v7  ;;  %v617_v3 = vmax.f32 %v615_v48, %v616_v8  ;;  %v566_v29 = vmax.f32 %v504_v16, %v506_v1 }
 0x105   : > { %v563_v28 = vmax.f32 %v561_v10, %v562_v15  ;;  %v622_v30 = vmax.f32 %v520_v11, %v522_v17  ;;  %v573_v33 = vmax.f32 %v505_v24, %v507_v26  ;;  %v604_v18 = vrot.slane %v603_v12, 2  ;;  %v692_v15 = vld [vmem:[%s1082_s2] sm:$0x3] }
 0x106   : > { %v557_v32 = vrot.slane %v556_v21, 1  ;;  %v629_v34 = vmax.f32 %v521_v4, %v523_v27  ;;  %v567_v36 = vrot.slane %v566_v29, 4  ;;  %v611_v38 = vrot.slane %v610_v14, 2 }
 0x107   : > { %v564_v35 = vrot.slane %v563_v28, 1  ;;  %v623_v37 = vrot.slane %v622_v30, 4  ;;  %v574_v23 = vrot.slane %v573_v33, 4  ;;  %v618_v41 = vrot.slane %v617_v3, 2 }
 0x108   : > { %v558_v20 = vmax.f32 %v556_v21, %v557_v32  ;;  %v630_v39 = vrot.slane %v629_v34, 4  ;;  %v568_v25 = vmax.f32 %v566_v29, %v567_v36  ;;  %v591_v43 = vmax.f32 %v1018_v22, %v590_v58 }
 0x109   : > { %v565_v40 = vmax.f32 %v563_v28, %v564_v35  ;;  %v624_v42 = vmax.f32 %v622_v30, %v623_v37  ;;  %v575_v45 = vmax.f32 %v573_v33, %v574_v23  ;;  %v598_v47 = vmax.f32 %v596_v2, %v597_v31 }
 0x10a   : > { %v663_v44 = vsel %vm662_vm3, %v558_v20, %v661_v0  ;;  %v631_v46 = vmax.f32 %v629_v34, %v630_v39  ;;  %v569_v49 = vrot.slane %v568_v25, 2  ;;  %v605_v51 = vmax.f32 %v603_v12, %v604_v18 }
 0x10b   : > { %v675_v48 = vsel %vm662_vm3, %v565_v40, %v674_v9  ;;  %v625_v50 = vrot.slane %v624_v42, 2  ;;  %v612_v52 = vmax.f32 %v610_v14, %v611_v38  ;;  %v576_v53 = vrot.slane %v575_v45, 2 }
 0x10c   : > { %v632_v54 = vrot.slane %v631_v46, 2  ;;  %v619_v55 = vmax.f32 %v617_v3, %v618_v41  ;;  %v570_v56 = vmax.f32 %v568_v25, %v569_v49  ;;  %v585_v59 = vrot.slane %v1031_v63, 1 }
 0x10d   : > { %v626_v57 = vmax.f32 %v624_v42, %v625_v50  ;;  %v695_v22 = vshrl.u32 %v694_v19, 7  ;;  %v577_v58 = vmax.f32 %v575_v45, %v576_v53  ;;  %v592_v61 = vrot.slane %v591_v43, 1 }
 0x10e   : > { %v633_v60 = vmax.f32 %v631_v46, %v632_v54  ;;  %v599_v62 = vrot.slane %v598_v47, 1  ;;  %v571_v0 = vrot.slane %v570_v56, 1  ;;  %v606_v2 = vrot.slane %v605_v51, 1 }
 0x10f   : > { %v613_v5 = vrot.slane %v612_v52, 1  ;;  %v578_v6 = vrot.slane %v577_v58, 1  ;;  %v620_v7 = vrot.slane %v619_v55, 1  ;;  %v627_v10 = vrot.slane %v626_v57, 1 }
 0x110   : > { %v572_v9 = vmax.f32 %v570_v56, %v571_v0  ;;  %v586_v8 = vmax.f32 %v1031_v63, %v585_v59  ;;  %v696_v19 = vsub.s32 0, %v695_v22  ;;  %v634_v12 = vrot.slane %v633_v60, 1 }
 0x111   : > { %v579_v11 = vmax.f32 %v577_v58, %v578_v6  ;;  %v593_v13 = vmax.f32 %v591_v43, %v592_v61  ;;  %v600_v14 = vmax.f32 %v598_v47, %v599_v62  ;;  %v700_v16 = vsub.s32 1, %v695_v22 }
 0x112   : > { %v665_v4 = vsel %vm664_vm4, %v572_v9, %v663_v44  ;;  %v607_v1 = vmax.f32 %v605_v51, %v606_v2  ;;  %v614_v17 = vmax.f32 %v612_v52, %v613_v5  ;;  %v621_v24 = vmax.f32 %v619_v55, %v620_v7 }
 0x113   : > { %v667_v21 = vsel %vm666_vm5, %v586_v8, %v665_v4  ;;  %v676_v63 = vsel %vm664_vm4, %v579_v11, %v675_v48  ;;  %v628_v26 = vmax.f32 %v626_v57, %v627_v10  ;;  %v697_v29 = vrot.slane %v692_v15, %v696_v19 }
 0x114   : > { %v669_v27 = vsel %vm668_vm6, %v600_v14, %v667_v21  ;;  %v677_v28 = vsel %vm666_vm5, %v593_v13, %v676_v63  ;;  %v635_v30 = vmax.f32 %v633_v60, %v634_v12  ;;  %v701_v34 = vrot.slane %v692_v15, %v700_v16 }
 0x115   : > { %v671_v3 = vsel %vm670_vm7, %v614_v17, %v669_v27  ;;  %v678_v31 = vsel %vm668_vm6, %v607_v1, %v677_v28 }
 0x116   : > { %v673_v32 = vsel %vm672_vm8, %v628_v26, %v671_v3  ;;  %v679_v33 = vsel %vm670_vm7, %v621_v24, %v678_v31 }
 0x117   : > { %v683_v18 = vmax.f32 %v673_v32, -1e+30  ;;  %v680_v35 = vsel %vm672_vm8, %v635_v30, %v679_v33 }
 0x118   : > { %v684_v36 = vmax.f32 %v680_v35, -1e+30 }
 0x119   : > { %v704_v37 = vadd.f32 %v697_v29, %v683_v18 }
 0x11a   : > { %v705_v20 = vadd.f32 %v701_v34, %v684_v36 }
 0x11b   : > { %v706_v38 = vmax.f32 %v704_v37, 0.0 }
 0x11c   : > { %v707_v23 = vmax.f32 %v705_v20, 0.0 }
 0x11d   : > { %708 = vst [vmem:[%s255_s25] sm:$0xff] %v706_v38 }
 0x11e   : > { %709 = vst [vmem:[%s255_s25 + $0x8] sm:$0xff] %v707_v23 }
 0x11f PF: > { %s14_s17 = sadd.s32 1, %s903_s17   ;;  %s1085_s15 = smov %s899_s16 }
 0x120   : > { %p11_p6 = scmp.ge.s32.totalorder %s14_s17, 4   ;;  %s1086_s16 = smov %s1088_s18 }
 0x122   :  { %13 = sbr.rel (!%p11_p6) target bundleno = 2 (0x2), region = 77 }

</bundles_post_ra>
